<compile_context>
chip_gen: v5e
topology: v5e:2x2
jax: 0.10.0
libtpu: 0.0.40
codegen_flags: <defaults>
</compile_context>

<pallas_src>
import functools

import jax
import jax.numpy as jnp
from jax.experimental import pallas as pl
from jax.experimental.pallas import tpu as pltpu

LANE = 128


def pack_ensemble_params(w1, b1, w2, b2, weight_dtype=jnp.bfloat16):
    """One-time prepack of per-model weights (call at model init, NOT per step).

    w1: (M, C, D), b1: (M, 1, D), w2: (M, D, K), b2: (M, 1, K)  — float32.
    """
    M, C, D = w1.shape
    K = w2.shape[-1]
    Dp = pl.cdiv(D, LANE) * LANE      # lane-dense per-model embedding width
    Kp = pl.cdiv(K, LANE) * LANE      # lane-dense logits width
    inv_m = 1.0 / M

    # Per-model D blocks padded to Dp so the in-kernel feat reduction uses
    # static, lane-aligned slices (no VMEM relayout copies).
    w1p = jnp.pad(w1, ((0, 0), (0, 0), (0, Dp - D)))                 # (M, C, Dp)
    b1p = jnp.pad(b1, ((0, 0), (0, 0), (0, Dp - D)))                 # (M, 1, Dp)
    w1s = jnp.transpose(w1p, (1, 0, 2)).reshape(C, M * Dp)           # (C, M*Dp)
    b1s = b1p.reshape(1, M * Dp)                                     # (1, M*Dp)

    # W2: rows padded D->Dp with zeros (padding feat cols contribute nothing),
    # columns padded K->Kp for a lane-dense output; 1/M folded in at init.
    w2p = jnp.pad(w2, ((0, 0), (0, Dp - D), (0, Kp - K))) * inv_m    # (M, Dp, Kp)
    w2s = w2p.reshape(M * Dp, Kp)                                    # (M*Dp, Kp)
    b2s = jnp.pad(jnp.sum(b2, axis=0), ((0, 0), (0, Kp - K))) * inv_m  # (1, Kp)

    return {
        "w1s": w1s.astype(weight_dtype),     # bf16 weight streams
        "w2s": w2s.astype(weight_dtype),
        "b1s": b1s.astype(jnp.float32),      # tiny biases stay f32
        "b2s": b2s.astype(jnp.float32),
        "M": M, "C": C, "D": D, "K": K, "Dp": Dp, "Kp": Kp,
    }


def _ensemble_kernel(pooled_ref, w1s_ref, b1s_ref, w2s_ref, b2s_ref,
                     out_ref, feat_ref, *, num_models, dp, inv_m):
    pooled = pooled_ref[...]                                         # (B, C) bf16

    # All M embedding heads at once: (B, C) @ (C, M*Dp), f32 accumulation.
    # Per-model b1 is applied before the ReLU (needed for the logits path).
    feat_all = jnp.dot(pooled, w1s_ref[...],
                       preferred_element_type=jnp.float32) + b1s_ref[...]
    h = jnp.maximum(feat_all, 0.0)                                   # (B, M*Dp)

    # mean_m out_m == relu(feat_all) @ vstack_m(W2_m / M) + mean_m b2_m.
    out = jnp.dot(h.astype(w2s_ref.dtype), w2s_ref[...],
                  preferred_element_type=jnp.float32) + b2s_ref[...]
    out_ref[...] = out.astype(out_ref.dtype)                         # (B, Kp)

    # mean_m feat_m: the feat path is linear, so just reduce the M lane-aligned
    # Dp blocks of feat_all (bias already inside). Static slices -> VPU adds.
    feat_sum = feat_all[:, 0:dp]
    for m in range(1, num_models):
        feat_sum = feat_sum + feat_all[:, m * dp:(m + 1) * dp]
    feat_ref[...] = (feat_sum * inv_m).astype(feat_ref.dtype)        # (B, Dp)


def ensembler_forward(x, packed):
    """x: (B, C, H, W) NCHW float32. Returns (all_out (B, K), all_feat (B, D))."""
    B, C, H, W = x.shape
    M, D, K = packed["M"], packed["D"], packed["K"]
    Dp, Kp = packed["Dp"], packed["Kp"]
    w1s, b1s = packed["w1s"], packed["b1s"]
    w2s, b2s = packed["w2s"], packed["b2s"]

    # Global average pool hoisted to XLA (glue reduction); cast activations to
    # the weight streaming dtype so both matmuls take the native bf16 MXU path.
    pooled = jnp.mean(x.reshape(B, C, H * W), axis=-1).astype(w1s.dtype)  # (B, C)

    kernel = functools.partial(_ensemble_kernel,
                               num_models=M, dp=Dp, inv_m=1.0 / M)
    vmem = pl.BlockSpec(memory_space=pltpu.MemorySpace.VMEM)

    # Everything is VMEM-resident in one shot (no grid): budget VMEM explicitly
    # so realistic EfficientAT sizes compile on v5e (16 MiB scoped default) and
    # leave headroom on v7x (64 MiB physical).
    operand_bytes = sum(int(a.size) * a.dtype.itemsize
                        for a in (pooled, w1s, b1s, w2s, b2s))
    result_bytes = 4 * B * (Kp + Dp)
    vmem_limit = min(max(32 << 20, 2 * (operand_bytes + result_bytes) + (2 << 20)),
                     96 << 20)

    out_pad, feat_pad = pl.pallas_call(
        kernel,
        out_shape=(jax.ShapeDtypeStruct((B, Kp), jnp.float32),
                   jax.ShapeDtypeStruct((B, Dp), jnp.float32)),
        in_specs=[vmem] * 5,
        out_specs=(vmem, vmem),
        compiler_params=pltpu.CompilerParams(vmem_limit_bytes=vmem_limit),
    )(pooled, w1s, b1s, w2s, b2s)

    return out_pad[:, :K], feat_pad[:, :D]


def _reference(x, w1, b1, w2, b2):
    """Pure-JAX f32 reference matching the PyTorch ensemble loop."""
    M = w1.shape[0]
    pooled = jnp.mean(x.reshape(x.shape[0], x.shape[1], -1), axis=-1)
    all_out = None
    all_feat = None
    for m in range(M):
        feat = pooled @ w1[m] + b1[m, 0]
        out = jnp.maximum(feat, 0.0) @ w2[m] + b2[m, 0]
        all_out = out if all_out is None else all_out + out
        all_feat = feat if all_feat is None else all_feat + feat
    return all_out / M, all_feat / M


if __name__ == "__main__":
    # Small shapes consistent with an NCHW spectrogram input.
    B, C, H, W = 2, 4, 16, 16
    M, D, K = 3, 32, 10          # 3 ensemble members, 32-d embedding, 10 classes

    key = jax.random.PRNGKey(0)
    kx, k1, k2, k3, k4 = jax.random.split(key, 5)
    x = jax.random.normal(kx, (B, C, H, W), dtype=jnp.float32)
    w1 = jax.random.normal(k1, (M, C, D), dtype=jnp.float32) * 0.1
    b1 = jax.random.normal(k2, (M, 1, D), dtype=jnp.float32) * 0.1
    w2 = jax.random.normal(k3, (M, D, K), dtype=jnp.float32) * 0.1
    b2 = jax.random.normal(k4, (M, 1, K), dtype=jnp.float32) * 0.1

    # Init-time prepack (done once; not part of the per-call path).
    packed = pack_ensemble_params(w1, b1, w2, b2)
    jax.block_until_ready(packed)

    out, feat = ensembler_forward(x, packed)
    jax.block_until_ready((out, feat))

    ref_out, ref_feat = _reference(x, w1, b1, w2, b2)
    assert out.shape == (B, K) and feat.shape == (B, D)
    # Weights stream as bf16 (f32 accumulation), so tolerance is looser than f32.
    assert jnp.allclose(out, ref_out, atol=2e-2, rtol=2e-2)
    assert jnp.allclose(feat, ref_feat, atol=2e-2, rtol=2e-2)

    print("KERNEL_OK")
</pallas_src>

<mosaic_0001>
module attributes {stable_mosaic.version = 11 : i64} {
  func.func @_ensemble_kernel(%arg0: memref<2x4xbf16, #tpu.memory_space<vmem>>, %arg1: memref<4x384xbf16, #tpu.memory_space<vmem>>, %arg2: memref<1x384xf32, #tpu.memory_space<vmem>>, %arg3: memref<384x128xbf16, #tpu.memory_space<vmem>>, %arg4: memref<1x128xf32, #tpu.memory_space<vmem>>, %arg5: memref<2x128xf32, #tpu.memory_space<vmem>>, %arg6: memref<2x128xf32, #tpu.memory_space<vmem>>) attributes {dimension_semantics = [], scalar_prefetch = 0 : i64, scratch_operands = 0 : i64, tpu.core_type = #tpu.core_type<tc>} {
    %c0 = arith.constant 0 : index
    %c0_0 = arith.constant 0 : index
    %0 = vector.load %arg0[%c0, %c0_0] : memref<2x4xbf16, #tpu.memory_space<vmem>>, vector<2x4xbf16>
    %c0_1 = arith.constant 0 : index
    %c0_2 = arith.constant 0 : index
    %1 = vector.load %arg1[%c0_1, %c0_2] : memref<4x384xbf16, #tpu.memory_space<vmem>>, vector<4x384xbf16>
    %cst = arith.constant dense<0.000000e+00> : vector<2x384xf32>
    %2 = tpu.matmul %0, %1, %cst {dimension_numbers = #tpu.dot_dimension_numbers<[1], [0], [0], [1], [0, 0, 1, 1], [], []>} : vector<2x4xbf16>, vector<4x384xbf16>, vector<2x384xf32> -> vector<2x384xf32>
    %c0_3 = arith.constant 0 : index
    %c0_4 = arith.constant 0 : index
    %3 = vector.load %arg2[%c0_3, %c0_4] : memref<1x384xf32, #tpu.memory_space<vmem>>, vector<1x384xf32>
    %4 = vector.broadcast %3 : vector<1x384xf32> to vector<2x384xf32>
    %5 = arith.addf %2, %4 : vector<2x384xf32>
    %cst_5 = arith.constant 0.000000e+00 : f32
    %6 = vector.broadcast %cst_5 : f32 to vector<2x384xf32>
    %7 = arith.maximumf %5, %6 : vector<2x384xf32>
    %8 = arith.truncf %7 : vector<2x384xf32> to vector<2x384xbf16>
    %c0_6 = arith.constant 0 : index
    %c0_7 = arith.constant 0 : index
    %9 = vector.load %arg3[%c0_6, %c0_7] : memref<384x128xbf16, #tpu.memory_space<vmem>>, vector<384x128xbf16>
    %cst_8 = arith.constant dense<0.000000e+00> : vector<2x128xf32>
    %10 = tpu.matmul %8, %9, %cst_8 {dimension_numbers = #tpu.dot_dimension_numbers<[1], [0], [0], [1], [0, 0, 1, 1], [], []>} : vector<2x384xbf16>, vector<384x128xbf16>, vector<2x128xf32> -> vector<2x128xf32>
    %c0_9 = arith.constant 0 : index
    %c0_10 = arith.constant 0 : index
    %11 = vector.load %arg4[%c0_9, %c0_10] : memref<1x128xf32, #tpu.memory_space<vmem>>, vector<1x128xf32>
    %12 = vector.broadcast %11 : vector<1x128xf32> to vector<2x128xf32>
    %13 = arith.addf %10, %12 : vector<2x128xf32>
    %c0_11 = arith.constant 0 : index
    %c0_12 = arith.constant 0 : index
    %14 = vector.load %arg5[%c0_11, %c0_12] : memref<2x128xf32, #tpu.memory_space<vmem>>, vector<2x128xf32>
    tpu.vector_store %arg5[%c0_11, %c0_12], %13 {strides = array<i32>} : memref<2x128xf32, #tpu.memory_space<vmem>>, vector<2x128xf32>,
    %15 = vector.extract_strided_slice %5 {offsets = [0, 0], sizes = [2, 128], strides = [1, 1]} : vector<2x384xf32> to vector<2x128xf32>
    %16 = vector.extract_strided_slice %5 {offsets = [0, 128], sizes = [2, 128], strides = [1, 1]} : vector<2x384xf32> to vector<2x128xf32>
    %17 = arith.addf %15, %16 : vector<2x128xf32>
    %18 = vector.extract_strided_slice %5 {offsets = [0, 256], sizes = [2, 128], strides = [1, 1]} : vector<2x384xf32> to vector<2x128xf32>
    %19 = arith.addf %17, %18 : vector<2x128xf32>
    %cst_13 = arith.constant 0.333333343 : f32
    %20 = vector.broadcast %cst_13 : f32 to vector<2x128xf32>
    %21 = arith.mulf %19, %20 : vector<2x128xf32>
    %c0_14 = arith.constant 0 : index
    %c0_15 = arith.constant 0 : index
    %22 = vector.load %arg6[%c0_14, %c0_15] : memref<2x128xf32, #tpu.memory_space<vmem>>, vector<2x128xf32>
    tpu.vector_store %arg6[%c0_14, %c0_15], %21 {strides = array<i32>} : memref<2x128xf32, #tpu.memory_space<vmem>>, vector<2x128xf32>,
    return
  }
}

</mosaic_0001>

<bundles_post_ra>
// kernel: tpu_custom_call.1
= control target key start
LH: loop header
LB: loop body
LE: loop exit
PB: predicated region body
PF: predicated region fallthrough
CT: control target
= control target key end

     0   :  { %12 = vsyncpa [#allocation3], 0  ;;  %s781_s0 = inlined_call_operand.hbm [shape: bf16[2,4], index: 0, kind: input, shape index: {}]   ;;  %s782_s1 = inlined_call_operand.hbm [shape: bf16[4,384], index: 1, kind: input, shape index: {}]   ;;  %s783_s2 = inlined_call_operand.hbm [shape: f32[1,384], index: 2, kind: input, shape index: {}]   ;;  %s784_s3 = inlined_call_operand.hbm [shape: bf16[384,128], index: 3, kind: input, shape index: {}]   ;;  %s785_s4 = inlined_call_operand.vmem [shape: f32[1,128], index: 4, kind: input, shape index: {}]   ;;  %s786_s5 = inlined_call_operand.hbm [shape: f32[2,128], index: 5, kind: output, shape index: {0}]   ;;  %s787_s6 = inlined_call_operand.hbm [shape: f32[2,128], index: 6, kind: output, shape index: {1}]  }
   0x1   :  { %13 = vsyncpa [#allocation6], 0 }
   0x2   :  { %14 = vsyncpa [#allocation9], 0 }
   0x3   :  { %15 = vsyncpa [#allocation4], 0  ;;  %s33_s23 = sshll.u32 %s782_s1, 4  ;;  %s34_s23 = int_to_ptr.hbm [resolvable:$true] %s33_s23 }
   0x4   :  { %16 = vsyncpa [#allocation12], 0  ;;  %s714_s24 = smov [#allocation5]   ;;  %s22_s28 = sshll.u32 %s781_s0, 4  ;;  %s23_s28 = int_to_ptr.hbm [resolvable:$true] %s22_s28 }
   0x5   :  { %s35_s25 = sshll.u32 %s714_s24, 4  ;;  %s715_s29 = smov [#allocation2]   ;;  %s36_s25 = int_to_ptr.vmem [resolvable:$true] %s35_s25 }
   0x6   :  { %38 = dma.hbm_to_vmem [thread:$0]  %s34_s23, 96, %s36_s25, [#allocation6]  }
   0x7   :  { %s24_s30 = sshll.u32 %s715_s29, 4  ;;  %s44_s9 = sshll.u32 %s783_s2, 4  ;;  %s25_s30 = int_to_ptr.vmem [resolvable:$true] %s24_s30  ;;  %s45_s9 = int_to_ptr.hbm [resolvable:$true] %s44_s9 }
   0x8   :  { %27 = dma.hbm_to_vmem [thread:$0]  %s23_s28, 16, %s25_s30, [#allocation3]  }
   0x9   :  { %s54_s11 = sshll.u32 %s784_s3, 4  ;;  %s716_s12 = smov [#allocation7]   ;;  %s55_s11 = int_to_ptr.hbm [resolvable:$true] %s54_s11 }
   0xa   :  { %s46_s13 = sshll.u32 %s716_s12, 4  ;;  %s717_s0 = smov [#allocation8]   ;;  %s47_s13 = int_to_ptr.vmem [resolvable:$true] %s46_s13 }
   0xb   :  { %49 = dma.hbm_to_vmem [thread:$0]  %s45_s9, 48, %s47_s13, [#allocation6]  }
   0xc   :  { %s56_s14 = sshll.u32 %s717_s0, 4  ;;  %s718_s15 = smov 64   ;;  %s57_s14 = int_to_ptr.vmem [resolvable:$true] %s56_s14 }
   0xd   :  { %s719_s16 = smov 4  }
   0xe   :  { %62 = dma.hbm_to_vmem [thread:$0]  %s55_s11, 3072, %s57_s14, [#allocation9], %s718_s15, %s718_s15, %s719_s16  }
   0xf   :  { %704 = dma.done.wait [#allocation3], 16  }
  0x10   :  { %705 = vsyncadd [#allocation3], 4294967280 }
  0x11   :  { %706 = dma.done.wait [#allocation6], 144  }
  0x12   :  { %707 = vsyncadd [#allocation6], 4294967152 }
  0x13   :  { %708 = dma.done.wait [#allocation9], 3072  }
  0x14   :  { %709 = vsyncadd [#allocation9], 4294964224  ;;  %v83_v0 = vld [vmem:[#allocation5] sm:$0x3f]  ;;  %vm101_vm0 = vcmask 1041408   ;;  %v532_v5 = vld [vmem:[#allocation8 + $0x28] sm:$0xff] }
  0x15   :  { %v534_v1 = vld [vmem:[#allocation8 + $0x38] sm:$0xff]  ;;  %93 = vst [vmem:[#allocation1] ss:$4 sm:$0xff] %v83_v0  ;;  %v533_v3 = vld [vmem:[#allocation8 + $0x30] sm:$0xff]  ;;  %v540_v6 = vld [vmem:[#allocation8 + $0x68] sm:$0xff]  ;;  %vm97_vm1 = vcmask 31744  }
  0x16   :  { %v542_v2 = vld [vmem:[#allocation8 + $0x78] sm:$0xff]  ;;  %349 = vmatpush.bf16.msra.mxu3 %v534_v1  ;;  %v541_v4 = vld [vmem:[#allocation8 + $0x70] sm:$0xff]  ;;  %v531_v15 = vld [vmem:[#allocation8 + $0x20] sm:$0xff]  ;;  %s720_s2 = smov [#allocation11]   ;;  %s411_s19 = sshll.u32 %s787_s6, 4  ;;  %s412_s19 = int_to_ptr.hbm [resolvable:$true] %s411_s19 }
  0x17   :  { %362 = vmatpush.bf16.msra.mxu0 %v542_v2  ;;  %v550_v7 = vld [vmem:[#allocation8 + $0xb8] sm:$0xff]  ;;  %v82_v13 = vld [vmem:[#allocation2] sm:$0x1]  ;;  %v539_v16 = vld [vmem:[#allocation8 + $0x60] sm:$0xff]  ;;  %s409_s3 = sshll.u32 %s720_s2, 4  ;;  %s721_s22 = smov [#allocation10]   ;;  %s410_s3 = int_to_ptr.vmem [resolvable:$true] %s409_s3 }
  0x18   :  { %v549_v17 = vld [vmem:[#allocation8 + $0xb0] sm:$0xff]  ;;  %v530_v18 = vld [vmem:[#allocation8 + $0x18] sm:$0xff]  ;;  %v528_v20 = vld [vmem:[#allocation8 + $0x8] sm:$0xff]  ;;  %s398_s23 = sshll.u32 %s721_s22, 4  ;;  %s400_s26 = sshll.u32 %s786_s5, 4  ;;  %s399_s23 = int_to_ptr.vmem [resolvable:$true] %s398_s23  ;;  %s401_s26 = int_to_ptr.hbm [resolvable:$true] %s400_s26 }
  0x19   :  { %v529_v19 = vld [vmem:[#allocation8 + $0x10] sm:$0xff]  ;;  %v538_v21 = vld [vmem:[#allocation8 + $0x58] sm:$0xff]  ;;  %v548_v22 = vld [vmem:[#allocation8 + $0xa8] sm:$0xff] }
  0x1a   :  { %350 = vmatpush.bf16.msra.mxu3 %v533_v3  ;;  %v527_v23 = vld [vmem:[#allocation8] sm:$0xff]  ;;  %v537_v24 = vld [vmem:[#allocation8 + $0x50] sm:$0xff]  ;;  %v536_v26 = vld [vmem:[#allocation8 + $0x48] sm:$0xff] }
  0x1b   :  { %363 = vmatpush.bf16.msra.mxu0 %v541_v4  ;;  %v547_v25 = vld [vmem:[#allocation8 + $0xa0] sm:$0xff]  ;;  %v546_v27 = vld [vmem:[#allocation8 + $0x98] sm:$0xff]  ;;  %v545_v29 = vld [vmem:[#allocation8 + $0x90] sm:$0xff] }
  0x1c   :  { %v94_v8 = vld.sshfl [vmem:[#allocation1] sm:$0xff pattern:$0x73625140]  ;;  %v96_v9 = vld.sshfl [vmem:[#allocation1 + $0x10] sm:$0xff pattern:$0x73625140] }
  0x1d   :  { %v102_v10 = vsel %vm101_vm0, %v94_v8, 0  ;;  %v106_v11 = vsel %vm101_vm0, %v96_v9, 0  ;;  %v95_v12 = vld.sshfl [vmem:[#allocation1 + $0x8] sm:$0xff pattern:$0x73625140]  ;;  %v535_v28 = vld [vmem:[#allocation8 + $0x40] sm:$0xff] }
  0x1e   :  { %115 = vmatpush.bf16.msra.mxu2 %v102_v10  ;;  %v104_v14 = vsel %vm101_vm0, %v95_v12, 0  ;;  %351 = vmatpush.bf16.msra.mxu3 %v532_v5  ;;  %v544_v30 = vld [vmem:[#allocation8 + $0x88] sm:$0xff]  ;;  %v543_v31 = vld [vmem:[#allocation8 + $0x80] sm:$0xff]  ;;  %v84_v32 = vld [vmem:[#allocation7] sm:$0x7] }
  0x1f   :  { %128 = vmatpush.bf16.msra.mxu1 %v104_v14  ;;  %364 = vmatpush.bf16.msra.mxu0 %v540_v6  ;;  %v87_v33 = vperm.slane %v84_v32, 1  ;;  %v86_v36 = vperm.slane %v84_v32, 0  ;;  %v88_v45 = vperm.slane %v84_v32, 2  ;;  %v559_v57 = vld [vmem:[%s785_s4] ss:$0 sm:$0xff] }
  0x21   :  { %428 = vmatmul.msk.bf16.vlgmr.msra.gmra.mxu2 %vm97_vm1, %v82_v13 }
  0x22   :  { %141 = vmatpush.bf16.msrb.mxu2 %v106_v11  ;;  %429 = vmatmul.msk.bf16.vlgmr.msra.gmra.mxu1 %vm97_vm1, %v82_v13 }
  0x23   :  { %375 = vmatpush.bf16.msrb.mxu1 %v550_v7  ;;  %352 = vmatpush.bf16.msra.mxu3 %v531_v15 }
  0x24   :  { %365 = vmatpush.bf16.msra.mxu0 %v539_v16 }
  0x27   :  { %376 = vmatpush.bf16.msrb.mxu1 %v549_v17  ;;  %353 = vmatpush.bf16.msra.mxu3 %v530_v18 }
  0x28   :  { %366 = vmatpush.bf16.msra.mxu0 %v538_v21 }
  0x2b   :  { %354 = vmatpush.bf16.msra.mxu3 %v529_v19  ;;  %377 = vmatpush.bf16.msrb.mxu1 %v548_v22 }
  0x2c   :  { %367 = vmatpush.bf16.msra.mxu0 %v537_v24 }
  0x2f   :  { %355 = vmatpush.bf16.msra.mxu3 %v528_v20  ;;  %378 = vmatpush.bf16.msrb.mxu1 %v547_v25 }
  0x30   :  { %368 = vmatpush.bf16.msra.mxu0 %v536_v26 }
  0x31   :  { %430 = vmatmul.msk.bf16.vlgmr.msrb.gmra.mxu2 %vm97_vm1, %v82_v13 }
  0x33   :  { %356 = vmatpush.bf16.msra.mxu3 %v527_v23  ;;  %379 = vmatpush.bf16.msrb.mxu1 %v546_v27 }
  0x34   :  { %369 = vmatpush.bf16.msra.mxu0 %v535_v28 }
  0x37   :  { %380 = vmatpush.bf16.msrb.mxu1 %v545_v29 }
  0x3b   :  { %381 = vmatpush.bf16.msrb.mxu1 %v544_v30 }
  0x3f   :  { %382 = vmatpush.bf16.msrb.mxu1 %v543_v31 }
  0x9f   :  { %v130_v34 = vpop.f32.mrf.mxu1 }
  0xa0   :  { %v131_v35 = vadd.f32 %v130_v34, %v87_v33 }
  0xa2   :  { %v148_v37 = vmax.f32 %v131_v35, 0.0 }
  0xa4   :  { %v117_v38 = vpop.f32.mrf.mxu2  ;;  %v151_v39 = vpack.c.bf16 %v148_v37, %v148_v37 }
  0xa5   :  { %v118_v40 = vadd.f32 %v117_v38, %v86_v36 }
  0xa6   :  { %370 = vmatmul.bf16.vlgmr.msra.gmra.mxu0 %v151_v39 }
  0xa7   :  { %v147_v41 = vmax.f32 %v118_v40, 0.0  ;;  %v132_v42 = vpop.f32.mrf.mxu1  ;;  %v389_v47 = vadd.f32 %v131_v35, %v118_v40 }
  0xa9   :  { %v150_v43 = vpack.c.bf16 %v147_v41, %v147_v41 }
  0xab   :  { %357 = vmatmul.bf16.vlgmr.msra.gmra.mxu3 %v150_v43 }
  0xac   :  { %v119_v44 = vpop.f32.mrf.mxu2 }
  0xb4   :  { %v143_v46 = vpop.f32.mrf.mxu2 }
  0xb5   :  { %v144_v48 = vadd.f32 %v143_v46, %v88_v45 }
  0xb7   :  { %v149_v49 = vmax.f32 %v144_v48, 0.0  ;;  %v390_v50 = vadd.f32 %v389_v47, %v144_v48 }
  0xb9   :  { %v152_v51 = vpack.c.bf16 %v149_v49, %v149_v49  ;;  %v391_v52 = vmul.f32 0.33333334, %v390_v50 }
  0xbb   :  { %392 = vst [vmem:[#allocation11] sm:$0x3] %v391_v52  ;;  %383 = vmatmul.bf16.vlgmr.msrb.gmra.mxu1 %v152_v51 }
  0xbc   :  { %v145_v53 = vpop.f32.mrf.mxu2  ;;  %414 = dma.vmem_to_hbm [thread:$0]  %s410_s3, 32, %s412_s19, [#allocation12]  }
 0x123   :  { %v371_v54 = vpop.f32.mrf.mxu0 }
 0x12b   :  { %v373_v55 = vpop.f32.mrf.mxu0 }
 0x12e   :  { %v358_v56 = vpop.f32.mrf.mxu3 }
 0x12f   :  { %v359_v58 = vadd.f32 %v559_v57, %v358_v56 }
 0x131   :  { %v372_v60 = vadd.f32 %v371_v54, %v359_v58 }
 0x136   :  { %v360_v59 = vpop.f32.mrf.mxu3 }
 0x138   :  { %v384_v61 = vpop.f32.mrf.mxu1 }
 0x139   :  { %v385_v62 = vadd.f32 %v384_v61, %v372_v60 }
 0x13b   :  { %388 = vst [vmem:[#allocation10] sm:$0x3] %v385_v62 }
 0x13c   :  { %403 = dma.vmem_to_hbm [thread:$0]  %s399_s23, 32, %s401_s26, [#allocation4]  }
 0x140   :  { %v386_v63 = vpop.f32.mrf.mxu1 }
 0x141   :  { %710 = dma.done.wait [#allocation4], 32  }
 0x142   :  { %711 = vsyncadd [#allocation4], 4294967264 }
 0x143   :  { %712 = dma.done.wait [#allocation12], 32  }
 0x144   :  { %713 = vsyncadd [#allocation12], 4294967264 }
 0x145   :  { %423 = vsyncpa [#allocation3], 1 }
 0x146   :  { %424 = vsyncpa [#allocation6], 1 }
 0x147   :  { %425 = vsyncpa [#allocation9], 1 }
 0x148   :  { %426 = vsyncpa [#allocation4], 1 }
 0x149   :  { %427 = vsyncpa [#allocation12], 1 }

</bundles_post_ra>
